<compile_context>
chip_gen: v7x
topology: tpu7x:2x2x1
jax: 0.10.0
libtpu: 0.0.40
codegen_flags: <defaults>
</compile_context>

<pallas_src>
import math
import jax
import jax.numpy as jnp
from jax.experimental import pallas as pl
from jax.experimental.pallas import tpu as pltpu

LANE = 128
SUBLANE = 8


def _round_up(a, b):
    return ((a + b - 1) // b) * b


def _make_freq_bands(max_freq_log2, N_freqs, log_sampling=True):
    """Replicates torch.linspace behaviour with Python floats (module stores a list)."""
    if N_freqs == 1:
        lin = [0.0]
    else:
        lin = [max_freq_log2 * i / (N_freqs - 1) for i in range(N_freqs)]
    if log_sampling:
        return [2.0 ** v for v in lin]
    lo, hi = 2.0 ** 0.0, 2.0 ** max_freq_log2
    if N_freqs == 1:
        return [lo]
    return [lo + (hi - lo) * i / (N_freqs - 1) for i in range(N_freqs)]


def _is_exact_octaves(freq_bands):
    """True when bands are exactly 1, 2, 4, 8, ... (standard NeRF log_sampling config)."""
    if len(freq_bands) == 0 or freq_bands[0] != 1.0:
        return False
    return all(freq_bands[i + 1] == 2.0 * freq_bands[i]
               for i in range(len(freq_bands) - 1))


def _make_embedder_kernel(freq_bands, include_input, use_octave_recurrence):
    """Elementwise hot path.

    x_ref: (tile_m, 128)           lane-dense input tile
    o_ref: (n_terms, tile_m, 128)  one full-width slab per embedding term
    """
    n_freqs = len(freq_bands)

    def kernel(x_ref, o_ref):
        x = x_ref[...].astype(jnp.float32)
        idx = 0
        if include_input:
            o_ref[0] = x.astype(o_ref.dtype)
            idx = 1
        if use_octave_recurrence and n_freqs > 0:
            # freq_bands == [1, 2, 4, ...]: one real sin/cos, then double-angle
            # recurrence (pure VPU work, ~3 ops/octave) for the higher octaves.
            s = jnp.sin(x)
            c = jnp.cos(x)
            o_ref[idx] = s.astype(o_ref.dtype)
            o_ref[idx + 1] = c.astype(o_ref.dtype)
            idx += 2
            for _ in range(n_freqs - 1):
                s, c = 2.0 * s * c, 1.0 - 2.0 * s * s
                o_ref[idx] = s.astype(o_ref.dtype)
                o_ref[idx + 1] = c.astype(o_ref.dtype)
                idx += 2
        else:
            for f in freq_bands:                      # compile-time Python floats
                xf = x * jnp.float32(f)
                o_ref[idx] = jnp.sin(xf).astype(o_ref.dtype)
                o_ref[idx + 1] = jnp.cos(xf).astype(o_ref.dtype)
                idx += 2

    return kernel


def embedder_forward(x, max_freq_log2, N_freqs, *,
                     log_sampling=True, include_input=True,
                     periodic_fns=("sin", "cos"), tile_m=1024,
                     out_dtype=None, interleave_output=True):
    """Pallas equivalent of Embedder.forward. x: [..., input_dim] float.

    interleave_output=True  -> exact PyTorch layout [..., out_dim].
    interleave_output=False -> term-major [n_terms, ..., input_dim] (skips the
                               post-kernel transpose; fold the permutation into
                               the consumer's first dense layer for free).
    """
    assert periodic_fns == ("sin", "cos"), "kernel hardcodes (sin, cos) as in the module default"
    input_dim = x.shape[-1]
    freq_bands = _make_freq_bands(max_freq_log2, N_freqs, log_sampling)
    n_terms = (1 if include_input else 0) + 2 * N_freqs
    out_dim = input_dim * n_terms
    out_dtype = jnp.dtype(out_dtype) if out_dtype is not None else x.dtype

    lead = x.shape[:-1]
    n_rows = math.prod(lead) if lead else 1
    n_elems = n_rows * input_dim

    # Lane-dense layout: flatten, pad only to an (8,128) granule, view as [m_pad, 128].
    m_rows = pl.cdiv(n_elems, LANE)
    m_pad = _round_up(m_rows, SUBLANE)

    # ---- tile selection ----
    tile_m_eff = max(SUBLANE, _round_up(min(tile_m, m_pad), SUBLANE))
    # Megacore: keep >= 4 grid steps when the input is big enough so v7x's 2 TCs
    # both get work; costs nothing on single-core parts.
    target_tiles = 4
    if m_pad >= target_tiles * SUBLANE:
        tile_m_eff = min(tile_m_eff,
                         max(SUBLANE, _round_up(pl.cdiv(m_pad, target_tiles), SUBLANE)))
    # VMEM budget: double-buffered (input + n_terms output) tiles must fit
    # comfortably on every generation (v7x has only 64 MiB physical VMEM/TC).
    in_item = jnp.dtype(x.dtype).itemsize
    out_item = jnp.dtype(out_dtype).itemsize
    bytes_per_row = (in_item + n_terms * out_item) * LANE
    vmem_budget = 24 << 20
    max_rows = max(SUBLANE, (vmem_budget // (2 * bytes_per_row)) // SUBLANE * SUBLANE)
    tile_m_eff = min(tile_m_eff, max_rows)

    grid = (pl.cdiv(m_pad, tile_m_eff),)
    step_bytes = 2 * bytes_per_row * tile_m_eff   # double-buffered in+out footprint
    vmem_limit = int(min(max(step_bytes + (4 << 20), 32 << 20), 48 << 20))

    total = m_pad * LANE
    x_flat = x.reshape(-1)
    if total > n_elems:
        x_flat = jnp.pad(x_flat, (0, total - n_elems))   # zeros: sin/cos are finite
    x2d = x_flat.reshape(m_pad, LANE)

    kernel = _make_embedder_kernel(
        freq_bands, include_input,
        use_octave_recurrence=(log_sampling and _is_exact_octaves(freq_bands)))

    out_stacked = pl.pallas_call(
        kernel,
        out_shape=jax.ShapeDtypeStruct((n_terms, m_pad, LANE), out_dtype),
        grid_spec=pltpu.PrefetchScalarGridSpec(
            num_scalar_prefetch=0,
            grid=grid,
            in_specs=[pl.BlockSpec((tile_m_eff, LANE), lambda i: (i, 0))],
            out_specs=pl.BlockSpec((n_terms, tile_m_eff, LANE), lambda i: (0, i, 0)),
        ),
        compiler_params=pltpu.CompilerParams(
            dimension_semantics=("parallel",),
            vmem_limit_bytes=vmem_limit,
        ),
    )(x2d)

    # Strip the (tiny) pad.
    terms = out_stacked.reshape(n_terms, m_pad * LANE)[:, :n_elems]
    terms = terms.reshape(n_terms, n_rows, input_dim)
    if not interleave_output:
        # Term-major layout; consumers fold the permutation into their weights.
        return terms.reshape(n_terms, *lead, input_dim)
    # Exact PyTorch concat order [x, sin(f0 x), cos(f0 x), sin(f1 x), ...].
    out2d = jnp.transpose(terms, (1, 0, 2)).reshape(n_rows, out_dim)
    return out2d.reshape(*lead, out_dim)


def embedder_reference(x, max_freq_log2, N_freqs, *, log_sampling=True, include_input=True):
    """Pure-JAX reference mirroring the PyTorch forward exactly."""
    freq_bands = _make_freq_bands(max_freq_log2, N_freqs, log_sampling)
    out = []
    if include_input:
        out.append(x)
    for f in freq_bands:
        out.append(jnp.sin(x * jnp.float32(f)))
        out.append(jnp.cos(x * jnp.float32(f)))
    return jnp.concatenate(out, axis=-1)


if __name__ == "__main__":
    # Deterministic example consistent with the module: batch of 2, 128 points,
    # 3-D coordinates (typical NeRF xyz input), 4 octave frequency bands.
    input_dim = 3
    max_freq_log2 = 3
    N_freqs = 4
    expected_out_dim = input_dim + input_dim * N_freqs * 2

    key = jax.random.PRNGKey(0)
    x = jax.random.normal(key, (2, 128, input_dim), dtype=jnp.float32)

    # 1) Octave bands -> double-angle recurrence path.
    out = jax.block_until_ready(
        embedder_forward(x, max_freq_log2, N_freqs,
                         log_sampling=True, include_input=True))
    ref = embedder_reference(x, max_freq_log2, N_freqs,
                             log_sampling=True, include_input=True)
    assert out.shape == (2, 128, expected_out_dim), out.shape
    assert out.dtype == x.dtype
    # Slightly looser tolerance: recurrence accumulates ~1 ulp per octave doubling.
    assert jnp.allclose(out, ref, atol=2e-5, rtol=2e-5)

    # 2) Flattened size NOT a multiple of 128 (exercises the minimal-pad path).
    x2 = jax.random.normal(jax.random.PRNGKey(1), (5, 37, input_dim), dtype=jnp.float32)
    out2 = jax.block_until_ready(
        embedder_forward(x2, max_freq_log2, N_freqs,
                         log_sampling=True, include_input=True))
    ref2 = embedder_reference(x2, max_freq_log2, N_freqs,
                              log_sampling=True, include_input=True)
    assert out2.shape == (5, 37, expected_out_dim), out2.shape
    assert jnp.allclose(out2, ref2, atol=2e-5, rtol=2e-5)

    # 3) Non-octave bands (direct sin/cos path), multi-step grid with an uneven
    #    trailing tile (m_pad = 80 rows, tile = 24 rows).
    x3 = jax.random.normal(jax.random.PRNGKey(2), (25, 128, input_dim), dtype=jnp.float32)
    out3 = jax.block_until_ready(
        embedder_forward(x3, max_freq_log2, N_freqs,
                         log_sampling=False, include_input=True))
    ref3 = embedder_reference(x3, max_freq_log2, N_freqs,
                              log_sampling=False, include_input=True)
    assert out3.shape == (25, 128, expected_out_dim), out3.shape
    assert jnp.allclose(out3, ref3, atol=1e-5, rtol=1e-5)

    # 4) Smoke test: bf16 output + term-major (no de-interleave) layout.
    out4 = jax.block_until_ready(
        embedder_forward(x, max_freq_log2, N_freqs,
                         log_sampling=True, include_input=True,
                         out_dtype=jnp.bfloat16, interleave_output=False))
    n_terms = 1 + 2 * N_freqs
    assert out4.shape == (n_terms, 2, 128, input_dim), out4.shape
    assert out4.dtype == jnp.bfloat16

    print("KERNEL_OK")
</pallas_src>

<mosaic_0001>
module attributes {stable_mosaic.version = 11 : i64} {
  func.func @kernel(%arg0: i32, %arg1: memref<8x128xf32, #tpu.memory_space<vmem>>, %arg2: memref<9x8x128xf32, #tpu.memory_space<vmem>>) attributes {dimension_semantics = [#tpu.dimension_semantics<parallel>], iteration_bounds = array<i64: 1>, scalar_prefetch = 0 : i64, scratch_operands = 0 : i64, tpu.core_type = #tpu.core_type<tc>, window_params = [{transform_indices = @transform_0, window_bounds = array<i64: 8, 128>}, {transform_indices = @transform_1, window_bounds = array<i64: 9, 8, 128>}]} {
    %c0 = arith.constant 0 : index
    %c0_0 = arith.constant 0 : index
    %0 = vector.load %arg1[%c0, %c0_0] : memref<8x128xf32, #tpu.memory_space<vmem>>, vector<8x128xf32>
    %c0_1 = arith.constant 0 : index
    %c0_2 = arith.constant 0 : index
    %c0_3 = arith.constant 0 : index
    %1 = vector.load %arg2[%c0_1, %c0_2, %c0_3] : memref<9x8x128xf32, #tpu.memory_space<vmem>>, vector<1x8x128xf32>
    %2 = vector.shape_cast %1 : vector<1x8x128xf32> to vector<8x128xf32>
    %3 = vector.shape_cast %0 : vector<8x128xf32> to vector<1x8x128xf32>
    tpu.vector_store %arg2[%c0_1, %c0_2, %c0_3], %3 {strides = array<i32>} : memref<9x8x128xf32, #tpu.memory_space<vmem>>, vector<1x8x128xf32>,
    %4 = math.sin %0 : vector<8x128xf32>
    %5 = math.cos %0 : vector<8x128xf32>
    %c1 = arith.constant 1 : index
    %c0_4 = arith.constant 0 : index
    %c0_5 = arith.constant 0 : index
    %6 = vector.load %arg2[%c1, %c0_4, %c0_5] : memref<9x8x128xf32, #tpu.memory_space<vmem>>, vector<1x8x128xf32>
    %7 = vector.shape_cast %6 : vector<1x8x128xf32> to vector<8x128xf32>
    %8 = vector.shape_cast %4 : vector<8x128xf32> to vector<1x8x128xf32>
    tpu.vector_store %arg2[%c1, %c0_4, %c0_5], %8 {strides = array<i32>} : memref<9x8x128xf32, #tpu.memory_space<vmem>>, vector<1x8x128xf32>,
    %c2 = arith.constant 2 : index
    %c0_6 = arith.constant 0 : index
    %c0_7 = arith.constant 0 : index
    %9 = vector.load %arg2[%c2, %c0_6, %c0_7] : memref<9x8x128xf32, #tpu.memory_space<vmem>>, vector<1x8x128xf32>
    %10 = vector.shape_cast %9 : vector<1x8x128xf32> to vector<8x128xf32>
    %11 = vector.shape_cast %5 : vector<8x128xf32> to vector<1x8x128xf32>
    tpu.vector_store %arg2[%c2, %c0_6, %c0_7], %11 {strides = array<i32>} : memref<9x8x128xf32, #tpu.memory_space<vmem>>, vector<1x8x128xf32>,
    %cst = arith.constant 2.000000e+00 : f32
    %12 = vector.broadcast %cst : f32 to vector<8x128xf32>
    %13 = arith.mulf %12, %4 : vector<8x128xf32>
    %14 = arith.mulf %13, %5 : vector<8x128xf32>
    %cst_8 = arith.constant 2.000000e+00 : f32
    %15 = vector.broadcast %cst_8 : f32 to vector<8x128xf32>
    %16 = arith.mulf %15, %4 : vector<8x128xf32>
    %17 = arith.mulf %16, %4 : vector<8x128xf32>
    %cst_9 = arith.constant 1.000000e+00 : f32
    %18 = vector.broadcast %cst_9 : f32 to vector<8x128xf32>
    %19 = arith.subf %18, %17 : vector<8x128xf32>
    %c3 = arith.constant 3 : index
    %c0_10 = arith.constant 0 : index
    %c0_11 = arith.constant 0 : index
    %20 = vector.load %arg2[%c3, %c0_10, %c0_11] : memref<9x8x128xf32, #tpu.memory_space<vmem>>, vector<1x8x128xf32>
    %21 = vector.shape_cast %20 : vector<1x8x128xf32> to vector<8x128xf32>
    %22 = vector.shape_cast %14 : vector<8x128xf32> to vector<1x8x128xf32>
    tpu.vector_store %arg2[%c3, %c0_10, %c0_11], %22 {strides = array<i32>} : memref<9x8x128xf32, #tpu.memory_space<vmem>>, vector<1x8x128xf32>,
    %c4 = arith.constant 4 : index
    %c0_12 = arith.constant 0 : index
    %c0_13 = arith.constant 0 : index
    %23 = vector.load %arg2[%c4, %c0_12, %c0_13] : memref<9x8x128xf32, #tpu.memory_space<vmem>>, vector<1x8x128xf32>
    %24 = vector.shape_cast %23 : vector<1x8x128xf32> to vector<8x128xf32>
    %25 = vector.shape_cast %19 : vector<8x128xf32> to vector<1x8x128xf32>
    tpu.vector_store %arg2[%c4, %c0_12, %c0_13], %25 {strides = array<i32>} : memref<9x8x128xf32, #tpu.memory_space<vmem>>, vector<1x8x128xf32>,
    %cst_14 = arith.constant 2.000000e+00 : f32
    %26 = vector.broadcast %cst_14 : f32 to vector<8x128xf32>
    %27 = arith.mulf %26, %14 : vector<8x128xf32>
    %28 = arith.mulf %27, %19 : vector<8x128xf32>
    %cst_15 = arith.constant 2.000000e+00 : f32
    %29 = vector.broadcast %cst_15 : f32 to vector<8x128xf32>
    %30 = arith.mulf %29, %14 : vector<8x128xf32>
    %31 = arith.mulf %30, %14 : vector<8x128xf32>
    %cst_16 = arith.constant 1.000000e+00 : f32
    %32 = vector.broadcast %cst_16 : f32 to vector<8x128xf32>
    %33 = arith.subf %32, %31 : vector<8x128xf32>
    %c5 = arith.constant 5 : index
    %c0_17 = arith.constant 0 : index
    %c0_18 = arith.constant 0 : index
    %34 = vector.load %arg2[%c5, %c0_17, %c0_18] : memref<9x8x128xf32, #tpu.memory_space<vmem>>, vector<1x8x128xf32>
    %35 = vector.shape_cast %34 : vector<1x8x128xf32> to vector<8x128xf32>
    %36 = vector.shape_cast %28 : vector<8x128xf32> to vector<1x8x128xf32>
    tpu.vector_store %arg2[%c5, %c0_17, %c0_18], %36 {strides = array<i32>} : memref<9x8x128xf32, #tpu.memory_space<vmem>>, vector<1x8x128xf32>,
    %c6 = arith.constant 6 : index
    %c0_19 = arith.constant 0 : index
    %c0_20 = arith.constant 0 : index
    %37 = vector.load %arg2[%c6, %c0_19, %c0_20] : memref<9x8x128xf32, #tpu.memory_space<vmem>>, vector<1x8x128xf32>
    %38 = vector.shape_cast %37 : vector<1x8x128xf32> to vector<8x128xf32>
    %39 = vector.shape_cast %33 : vector<8x128xf32> to vector<1x8x128xf32>
    tpu.vector_store %arg2[%c6, %c0_19, %c0_20], %39 {strides = array<i32>} : memref<9x8x128xf32, #tpu.memory_space<vmem>>, vector<1x8x128xf32>,
    %cst_21 = arith.constant 2.000000e+00 : f32
    %40 = vector.broadcast %cst_21 : f32 to vector<8x128xf32>
    %41 = arith.mulf %40, %28 : vector<8x128xf32>
    %42 = arith.mulf %41, %33 : vector<8x128xf32>
    %cst_22 = arith.constant 2.000000e+00 : f32
    %43 = vector.broadcast %cst_22 : f32 to vector<8x128xf32>
    %44 = arith.mulf %43, %28 : vector<8x128xf32>
    %45 = arith.mulf %44, %28 : vector<8x128xf32>
    %cst_23 = arith.constant 1.000000e+00 : f32
    %46 = vector.broadcast %cst_23 : f32 to vector<8x128xf32>
    %47 = arith.subf %46, %45 : vector<8x128xf32>
    %c7 = arith.constant 7 : index
    %c0_24 = arith.constant 0 : index
    %c0_25 = arith.constant 0 : index
    %48 = vector.load %arg2[%c7, %c0_24, %c0_25] : memref<9x8x128xf32, #tpu.memory_space<vmem>>, vector<1x8x128xf32>
    %49 = vector.shape_cast %48 : vector<1x8x128xf32> to vector<8x128xf32>
    %50 = vector.shape_cast %42 : vector<8x128xf32> to vector<1x8x128xf32>
    tpu.vector_store %arg2[%c7, %c0_24, %c0_25], %50 {strides = array<i32>} : memref<9x8x128xf32, #tpu.memory_space<vmem>>, vector<1x8x128xf32>,
    %c8 = arith.constant 8 : index
    %c0_26 = arith.constant 0 : index
    %c0_27 = arith.constant 0 : index
    %51 = vector.load %arg2[%c8, %c0_26, %c0_27] : memref<9x8x128xf32, #tpu.memory_space<vmem>>, vector<1x8x128xf32>
    %52 = vector.shape_cast %51 : vector<1x8x128xf32> to vector<8x128xf32>
    %53 = vector.shape_cast %47 : vector<8x128xf32> to vector<1x8x128xf32>
    tpu.vector_store %arg2[%c8, %c0_26, %c0_27], %53 {strides = array<i32>} : memref<9x8x128xf32, #tpu.memory_space<vmem>>, vector<1x8x128xf32>,
    return
  }
  func.func @transform_0(%arg0: i32) -> (i32, i32) {
    %c0_i32 = arith.constant 0 : i32
    %c0_i32_0 = arith.constant 0 : i32
    return %arg0, %c0_i32 : i32, i32
  }
  func.func @transform_1(%arg0: i32) -> (i32, i32, i32) {
    %c0_i32 = arith.constant 0 : i32
    %c0_i32_0 = arith.constant 0 : i32
    %c0_i32_1 = arith.constant 0 : i32
    return %c0_i32, %arg0, %c0_i32_0 : i32, i32, i32
  }
}

</mosaic_0001>

<bundles_post_ra>
// kernel: tpu_custom_call.1
= control target key start
LH: loop header
LB: loop body
LE: loop exit
PB: predicated region body
PF: predicated region fallthrough
CT: control target
= control target key end

     0   :  { %6 = vsyncpa [#allocation3], 0  ;;  %s415_s0 = inlined_call_operand.hbm [shape: f32[8,128], index: 0, kind: input, shape index: {}]   ;;  %s416_s1 = inlined_call_operand.hbm [shape: f32[9,8,128], index: 1, kind: output, shape index: {}]  }
   0x1   :  { %7 = vsyncpa [#allocation4], 0  ;;  %s349_s6 = smov [#allocation2]   ;;  %s301_s10 = scalar_lea.hbm %s415_s0, 128 }
   0x2   :  { %s14_s7 = sshll.u32 %s349_s6, 4  ;;  %p302_p0 = scmp.ne.s32.totalorder %s415_s0, %s301_s10  ;;  %s15_s7 = int_to_ptr.vmem [resolvable:$true] %s14_s7 }
   0x3   :  { %p305_p1 = scmp.lt.u32.totalorder %s301_s10, %s415_s0 }
   0x5   :  { %p307_p2 = pnand %p305_p1, %p302_p0 }
   0x7   :  { %310 = shalt.err (!%p307_p2)
}
   0x8   :  { %s311_s15 = scalar_lea.vmem %s15_s7, 128  ;;  %p316_p4 = scmp.lt.s32.totalorder %s15_s7, %s15_s7 }
   0x9   :  { %p312_p3 = scmp.ne.s32.totalorder %s15_s7, %s311_s15  ;;  %p317_p5 = scmp.lt.s32.totalorder %s311_s15, %s311_s15 }
   0xb   :  { %p318_p6 = por %p317_p5, %p316_p4 }
   0xd   :  { %p319_p7 = pnand %p318_p6, %p312_p3 }
   0xf   :  { %322 = shalt.err (!%p319_p7)
}
  0x10   :  { %17 = dma.hbm_to_vmem [thread:$0]  %s415_s0, 128, %s15_s7, [#allocation3]  }
  0x11   :  { %345 = dma.done.wait [#allocation3], 128  }
  0x12   :  { %346 = vsyncadd [#allocation3], 4294967168  ;;  %v381_v0 = vld [vmem:[#allocation2] sm:$0xff]  ;;  %v350_v12 = vmov 683565275   ;;  %s356_s0 = smov [#allocation5]  }
  0x13   :  { %22 = vst [vmem:[#allocation5] sm:$0xff] %v381_v0  ;;  %v26_v1 = vand.u32 2139095040, %v381_v0  ;;  %v23_v3 = vand.u32 2147483647, %v381_v0  ;;  %v351_v14 = vmov 2475754826   ;;  %vm115_vm15 = vweird.f32 %v381_v0 }
  0x14   :  { %v352_v16 = vmov 2131351028   ;;  %v353_v18 = vmov 2102212464   ;;  %v354_v20 = vmov 920167782  }
  0x15   :  { %v27_v2 = vshrl.u32 %v26_v1, 23  ;;  %v30_v6 = vand.u32 8388607, %v23_v3  ;;  %v355_v27 = vmov 1326507024   ;;  %vm25_vm7 = vcmp.lt.s32.totalorder %v381_v0, 0 }
  0x16   :  { %vm24_vm8 = vcmp.le.f32.partialorder %v23_v3, 0.7853982  ;;  %s263_s18 = sshll.u32 %s356_s0, 4  ;;  %s264_s18 = int_to_ptr.vmem [resolvable:$true] %s263_s18 }
  0x17   :  { %v275_v4 = vadd.s32 4294967169, %v27_v2  ;;  %v31_v10 = vor.u32 8388608, %v30_v6  ;;  %s323_s19 = scalar_lea.vmem %s264_s18, 1152  ;;  %p328_p9 = scmp.lt.s32.totalorder %s264_s18, %s264_s18 }
  0x18   :  { %p324_p8 = scmp.ne.s32.totalorder %s264_s18, %s323_s19  ;;  %p329_p10 = scmp.lt.s32.totalorder %s323_s19, %s323_s19 }
  0x19   :  { %v33_v5 = vadd.s32 1, %v275_v4  ;;  %v71_v29 = vshll.u32 %v31_v10, 8 }
  0x1a   :  { %p330_p11 = por %p329_p10, %p328_p9 }
  0x1b   :  { %vm34_vm0 = vcmp.gt.s32.totalorder %v33_v5, 0 }
  0x1c   :  { %v35_v7 = vsel %vm34_vm0, %v33_v5, 0  ;;  %p331_p12 = pnand %p330_p11, %p324_p8 }
  0x1d   :  { %v37_v8 = vand.u32 31, %v35_v7  ;;  %v36_v9 = vshrl.u32 %v35_v7, 5 }
  0x1f   :  { %v38_v11 = vsub.s32 32, %v37_v8  ;;  %v40_v13 = vshll.u32 %v350_v12, %v37_v8  ;;  %v43_v15 = vshll.u32 %v351_v14, %v37_v8  ;;  %v46_v17 = vshll.u32 %v352_v16, %v37_v8 }
  0x20   :  { %v49_v19 = vshll.u32 %v353_v18, %v37_v8  ;;  %v52_v21 = vshll.u32 %v354_v20, %v37_v8  ;;  %vm55_vm1 = vcmp.lt.s32.totalorder %v36_v9, 1  ;;  %vm58_vm2 = vcmp.lt.s32.totalorder %v36_v9, 4 }
  0x21   :  { %v39_v22 = vshrl.u32 %v350_v12, %v38_v11  ;;  %v41_v23 = vshrl.u32 %v351_v14, %v38_v11  ;;  %v44_v24 = vshrl.u32 %v352_v16, %v38_v11  ;;  %v47_v25 = vshrl.u32 %v353_v18, %v38_v11 }
  0x22   :  { %v50_v26 = vshrl.u32 %v354_v20, %v38_v11  ;;  %v53_v28 = vshrl.u32 %v355_v27, %v38_v11  ;;  %vm56_vm3 = vcmp.lt.s32.totalorder %v36_v9, 2  ;;  %vm57_vm4 = vcmp.lt.s32.totalorder %v36_v9, 3 }
  0x23   :  { %v42_v30 = vor.u32 %v41_v23, %v40_v13  ;;  %v45_v31 = vor.u32 %v44_v24, %v43_v15  ;;  %v48_v32 = vor.u32 %v47_v25, %v46_v17 }
  0x24   :  { %v51_v33 = vor.u32 %v50_v26, %v49_v19  ;;  %v54_v34 = vor.u32 %v53_v28, %v52_v21 }
  0x25   :  { %v59_v35 = vsel %vm55_vm1, %v39_v22, %v42_v30  ;;  %v60_v36 = vsel %vm58_vm2, %v48_v32, 2102212464  ;;  %v63_v37 = vsel %vm55_vm1, %v42_v30, %v45_v31  ;;  %v67_v38 = vsel %vm55_vm1, %v45_v31, %v48_v32 }
  0x26   :  { %v61_v39 = vsel %vm57_vm4, %v45_v31, %v60_v36  ;;  %v64_v40 = vsel %vm58_vm2, %v51_v33, 920167782  ;;  %v68_v41 = vsel %vm58_vm2, %v54_v34, 1326507024 }
  0x27   :  { %v65_v42 = vsel %vm57_vm4, %v48_v32, %v64_v40  ;;  %v69_v43 = vsel %vm57_vm4, %v51_v33, %v68_v41  ;;  %v62_v44 = vsel %vm56_vm3, %v59_v35, %v61_v39 }
  0x28   :  { %v66_v45 = vsel %vm56_vm3, %v63_v37, %v65_v42  ;;  %v70_v46 = vsel %vm56_vm3, %v67_v38, %v69_v43  ;;  %v78_v51 = vmul.u32 %v71_v29, %v62_v44 }
  0x29   :  { %v388_v47 = vmul.u32.u64.low %v71_v29, %v70_v46  ;;  %v389_v48 = vmul.u32.u64.high %v71_v29, %v70_v46, %v388_v47  ;;  %v391_v49 = vmul.u32.u64.low %v71_v29, %v66_v45  ;;  %v392_v50 = vmul.u32.u64.high %v71_v29, %v66_v45, %v391_v49 }
  0x2b   :  { %vm80_vm5 = vc.u32 %v389_v48, %v391_v49  ;;  %v81_v52 = vadd.s32 1, %v392_v50  ;;  %v79_v63 = vadd.s32 %v391_v49, %v389_v48 }
  0x2d   :  { %v82_v53 = vsel %vm80_vm5, %v81_v52, %v392_v50 }
  0x2e   :  { %v83_v54 = vadd.s32 %v82_v53, %v78_v51 }
  0x30   :  { %v84_v55 = vadd.s32 536870912, %v83_v54 }
  0x32   :  { %v85_v56 = vshrl.u32 %v84_v55, 30 }
  0x34   :  { %v86_v57 = vshll.u32 %v85_v56, 30  ;;  %v109_v13 = vsub.s32 4, %v85_v56 }
  0x36   :  { %v87_v58 = vsub.s32 %v83_v54, %v86_v57  ;;  %v110_v16 = vsel %vm25_vm7, %v109_v13, %v85_v56 }
  0x37   :  { %v112_v19 = vsel %vm24_vm8, 0, %v110_v16 }
  0x38   :  { %v89_v59 = vsub.s32 0, %v87_v58  ;;  %v116_v20 = vadd.s32 3, %v112_v19  ;;  %v220_v22 = vand.u32 3, %v112_v19 }
  0x3a   :  { %v276_v60 = vmin.u32 %v89_v59, %v87_v58  ;;  %v117_v21 = vand.u32 3, %v116_v20  ;;  %vm225_vm10 = vcmp.eq.s32.totalorder %v220_v22, 2  ;;  %vm222_vm12 = vcmp.eq.s32.totalorder %v220_v22, 0 }
  0x3b   :  { %vm221_vm14 = vcmp.lt.s32.totalorder %v220_v22, 2 }
  0x3c   :  { %v91_v61 = vclz %v276_v60  ;;  %vm122_vm9 = vcmp.eq.s32.totalorder %v117_v21, 2  ;;  %vm119_vm11 = vcmp.eq.s32.totalorder %v117_v21, 0  ;;  %vm118_vm13 = vcmp.lt.s32.totalorder %v117_v21, 2 }
  0x3e   :  { %v277_v62 = vadd.s32 4294967294, %v91_v61 }
  0x40   :  { %vm278_vm6 = vcmp.lt.s32.totalorder %v277_v62, 0 }
  0x41   :  { %v94_v1 = vsel %vm278_vm6, 0, %v277_v62 }
  0x42   :  { %v95_v2 = vsub.s32 32, %v94_v1  ;;  %v96_v4 = vshll.u32 %v87_v58, %v94_v1  ;;  %v99_v5 = vsub.s32 4294967266, %v94_v1 }
  0x44   :  { %v97_v6 = vshrl.u32 %v79_v63, %v95_v2  ;;  %v100_v7 = vadd.s32 127, %v99_v5 }
  0x46   :  { %v98_v8 = vor.u32 %v97_v6, %v96_v4  ;;  %v101_v9 = vshll.u32 %v100_v7, 23 }
  0x48   :  { %v102_v10 = vor.u32 4788187, %v101_v9  ;;  %v105_v11 = vcvt.s32.f32 %v98_v8 }
  0x4a   :  { %v103_v12 = vand.u32 2147483647, %v102_v10 }
  0x4c   :  { %v106_v14 = vmul.f32 %v105_v11, %v103_v12 }
  0x4e   :  { %v107_v15 = vxor.u32 2147483648, %v106_v14 }
  0x50   :  { %v108_v17 = vsel %vm25_vm7, %v107_v15, %v106_v14 }
  0x51   :  { %v111_v18 = vsel %vm24_vm8, %v381_v0, %v108_v17 }
  0x52   :  { %297 = vcosq.f32 %v111_v18 }
  0x53   :  { %299 = vsinq.f32 %v111_v18 }
  0x5c   :  { %v298_v23 = vpop.eup %297 }
  0x5d   :  { %v300_v24 = vpop.eup %299  ;;  %v123_v25 = vxor.u32 2147483648, %v298_v23 }
  0x5e   :  { %v120_v3 = vxor.u32 2147483648, %v300_v24 }
  0x5f   :  { %v124_v26 = vsel %vm122_vm9, %v123_v25, %v300_v24  ;;  %v227_v27 = vsel %vm225_vm10, %v123_v25, %v300_v24 }
  0x60   :  { %v121_v28 = vsel %vm119_vm11, %v298_v23, %v120_v3  ;;  %v224_v29 = vsel %vm222_vm12, %v298_v23, %v120_v3 }
  0x61   :  { %v125_v30 = vsel %vm118_vm13, %v121_v28, %v124_v26  ;;  %v228_v31 = vsel %vm221_vm14, %v224_v29, %v227_v27 }
  0x62   :  { %v126_v32 = vsel %vm115_vm15, nan, %v125_v30  ;;  %v229_v33 = vsel %vm115_vm15, nan, %v228_v31 }
  0x63   :  { %231 = vst [vmem:[#allocation5 + $0x8] sm:$0xff] %v126_v32  ;;  %233 = vst [vmem:[#allocation5 + $0x10] sm:$0xff] %v229_v33  ;;  %v234_v34 = vmul.f32 2.0, %v126_v32 }
  0x65   :  { %v235_v35 = vmul.f32 %v234_v34, %v229_v33  ;;  %v236_v36 = vmul.f32 %v234_v34, %v126_v32 }
  0x67   :  { %239 = vst [vmem:[#allocation5 + $0x18] sm:$0xff] %v235_v35  ;;  %v237_v37 = vsub.f32 1.0, %v236_v36  ;;  %v242_v38 = vmul.f32 2.0, %v235_v35 }
  0x69   :  { %241 = vst [vmem:[#allocation5 + $0x20] sm:$0xff] %v237_v37  ;;  %v243_v39 = vmul.f32 %v242_v38, %v237_v37  ;;  %v244_v40 = vmul.f32 %v242_v38, %v235_v35 }
  0x6b   :  { %247 = vst [vmem:[#allocation5 + $0x28] sm:$0xff] %v243_v39  ;;  %v245_v0 = vsub.f32 1.0, %v244_v40  ;;  %v250_v41 = vmul.f32 2.0, %v243_v39 }
  0x6d   :  { %249 = vst [vmem:[#allocation5 + $0x30] sm:$0xff] %v245_v0  ;;  %v251_v42 = vmul.f32 %v250_v41, %v245_v0  ;;  %v252_v43 = vmul.f32 %v250_v41, %v243_v39 }
  0x6f   :  { %255 = vst [vmem:[#allocation5 + $0x38] sm:$0xff] %v251_v42  ;;  %v253_v44 = vsub.f32 1.0, %v252_v43 }
  0x71   :  { %257 = vst [vmem:[#allocation5 + $0x40] sm:$0xff] %v253_v44 }
  0x72   :  { %334 = shalt.err (!%p331_p12)
}
  0x73   :  { %s335_s22 = scalar_lea.hbm %s416_s1, 1152 }
  0x74   :  { %p336_p13 = scmp.ne.s32.totalorder %s416_s1, %s335_s22  ;;  %p339_p0 = scmp.lt.u32.totalorder %s335_s22, %s416_s1 }
  0x76   :  { %p341_p1 = pnand %p339_p0, %p336_p13 }
  0x78   :  { %344 = shalt.err (!%p341_p1)
}
  0x79   :  { %s357_s27 = smov 128   ;;  %s358_s28 = smov 8  }
  0x7a   :  { %269 = dma.vmem_to_hbm [thread:$0]  %s264_s18, 1152, %s416_s1, [#allocation4], %s357_s27, %s357_s27, %s358_s28  }
  0x7b   :  { %347 = dma.done.wait [#allocation4], 1152  }
  0x7c   :  { %348 = vsyncadd [#allocation4], 4294966144 }
  0x7d   :  { %273 = vsyncpa [#allocation3], 1 }
  0x7e   :  { %274 = vsyncpa [#allocation4], 1 }

</bundles_post_ra>
